<compile_context>
chip_gen: v7x
topology: tpu7x:2x2x1
jax: 0.10.0
libtpu: 0.0.40
codegen_flags: <defaults>
</compile_context>

<pallas_src>
import jax
import jax.numpy as jnp
from jax.experimental import pallas as pl
from jax.experimental.pallas import tpu as pltpu

NEG_SLOPE = 0.01                     # F.leaky_relu default negative_slope
LANE = 128                           # padded width for hidden dims / logits
NEG_INF_BIAS = -1e30                 # padded head-bias lanes -> softmax prob 0 (keep f32!)
MAX_TILE_ROWS = 4096                 # rows per grid step at large batch
VMEM_LIMIT_BYTES = 48 * 1024 * 1024  # > v5e's 16 MiB default, < v7x's 64 MiB physical


def _round_up(x, m):
    return (x + m - 1) // m * m


def _cdiv(a, b):
    return -(-a // b)


def _leaky_relu(x):
    return jnp.where(x > 0, x, NEG_SLOPE * x)


def policy_net_kernel(x_ref, w1_ref, wh_ref, b_ref, out_ref):
    # x: (bt, input_size) original dtype -> bf16 for the MXU.
    x = x_ref[...].astype(jnp.bfloat16)
    b = b_ref[...]                                            # (4, LANE) f32

    h = jnp.dot(x, w1_ref[...], preferred_element_type=jnp.float32) + b[0:1, :]
    h = _leaky_relu(h)

    h = jnp.dot(h.astype(jnp.bfloat16), wh_ref[0],
                preferred_element_type=jnp.float32) + b[1:2, :]
    h = _leaky_relu(h)

    h = jnp.dot(h.astype(jnp.bfloat16), wh_ref[1],
                preferred_element_type=jnp.float32) + b[2:3, :]
    h = _leaky_relu(h)

    logits = jnp.dot(h.astype(jnp.bfloat16), wh_ref[2],
                     preferred_element_type=jnp.float32) + b[3:4, :]

    # Row-wise softmax over the padded 128-wide logits; padded lanes have
    # logit ~ -1e30 so exp underflows to exactly 0.
    m = jnp.max(logits, axis=1, keepdims=True)
    e = jnp.exp(logits - m)
    denom = jnp.sum(e, axis=1, keepdims=True)
    inv = pl.reciprocal(denom, approx=True)    # EUP vrcp slot (off the VPU path)
    inv = inv * (2.0 - denom * inv)            # one Newton step -> ~f32 accuracy
    probs = e * inv

    # Narrow (ACT_PAD-lane) output block: block last dim == full array last dim.
    out_ref[...] = probs[:, :out_ref.shape[1]].astype(out_ref.dtype)


def prepare_params(params, input_size, num_actions):
    """Pad hidden/action dims to LANE; pack resident params.

    Weights are stored (in_features, out_features) (transposed vs. PyTorch),
    cast to bf16.  Biases may be 1-D (PyTorch layout) or (1, fan_out); they
    stay f32, and padded head-bias lanes are -1e30 (invariant: never cast the
    bias array to bf16, or -1e30 becomes -inf).
    """
    assert num_actions <= LANE, "num_actions > 128 not supported by this kernel"

    def pad_w(w, rows, cols):
        w = jnp.asarray(w, jnp.float32)
        out = jnp.zeros((rows, cols), jnp.float32)
        out = out.at[:w.shape[0], :w.shape[1]].set(w)
        return out.astype(jnp.bfloat16)

    def pad_b(b, fill=0.0):
        b = jnp.asarray(b, jnp.float32).reshape(1, -1)     # handles 1-D torch biases
        out = jnp.full((1, LANE), fill, jnp.float32)
        return out.at[:, :b.shape[1]].set(b)

    w1 = pad_w(params["w1"], input_size, LANE)
    wh = jnp.stack([pad_w(params["w2"], LANE, LANE),
                    pad_w(params["w3"], LANE, LANE),
                    pad_w(params["w4"], LANE, LANE)], axis=0)       # (3, 128, 128) bf16
    bias = jnp.concatenate([pad_b(params["b1"]),
                            pad_b(params["b2"]),
                            pad_b(params["b3"]),
                            pad_b(params["b4"], fill=NEG_INF_BIAS)], axis=0)  # (4, 128) f32
    return {"w1": w1, "wh": wh, "b": bias}


def _choose_tiling(batch):
    """Pick (rows_per_step, num_steps).  >=2 steps whenever >=32 rows (v7x megacore)."""
    rows = _round_up(max(batch, 16), 16)
    if rows < 32:
        return rows, 1
    num_steps = max(2, _cdiv(rows, MAX_TILE_ROWS))
    bt = _round_up(_cdiv(rows, num_steps), 16)
    num_steps = _cdiv(rows, bt)
    return bt, num_steps


def policy_network_forward(x, padded_params, num_actions):
    """x: (batch, input_size) f32/bf16.  Returns (batch, num_actions) f32 probs."""
    batch, input_size = x.shape
    act_pad = max(8, _round_up(num_actions, 8))

    bt, num_steps = _choose_tiling(batch)
    padded_rows = bt * num_steps
    if padded_rows != batch:
        x = jnp.pad(x, ((0, padded_rows - batch), (0, 0)))   # single cheap pad pass

    p = padded_params
    param_bytes = sum(int(v.nbytes) for v in p.values())
    flops = 2 * padded_rows * (input_size * LANE + 3 * LANE * LANE)
    cost = pl.CostEstimate(
        flops=flops,
        transcendentals=padded_rows * LANE,
        bytes_accessed=int(x.nbytes) + padded_rows * act_pad * 4 + param_bytes)

    out = pl.pallas_call(
        policy_net_kernel,
        out_shape=jax.ShapeDtypeStruct((padded_rows, act_pad), jnp.float32),
        grid=(num_steps,),
        in_specs=[
            pl.BlockSpec((bt, input_size), lambda i: (i, 0)),     # x: streamed by batch
            pl.BlockSpec((input_size, LANE), lambda i: (0, 0)),   # w1: VMEM-resident
            pl.BlockSpec((3, LANE, LANE), lambda i: (0, 0, 0)),   # w2..w4: VMEM-resident
            pl.BlockSpec((4, LANE), lambda i: (0, 0)),            # b1..b4: VMEM-resident
        ],
        out_specs=pl.BlockSpec((bt, act_pad), lambda i: (i, 0)),
        compiler_params=pltpu.CompilerParams(
            dimension_semantics=("parallel",),    # batch split across v7x's 2 TCs
            vmem_limit_bytes=VMEM_LIMIT_BYTES),
        cost_estimate=cost,
    )(x, p["w1"], p["wh"], p["b"])

    # Wrapper-side slice back to real rows / actions (free layout plumbing).
    return out[:batch, :num_actions]


def init_params(key, input_size, num_actions):
    """Deterministic init mimicking nn.Linear's U(-1/sqrt(fan_in), 1/sqrt(fan_in)).

    Weights stored transposed vs. PyTorch: (in_features, out_features).
    Biases are 1-D, like a raw PyTorch state dict.
    """
    dims = [(input_size, 64), (64, 128), (128, 64), (64, num_actions)]
    params = {}
    for i, (fan_in, fan_out) in enumerate(dims, start=1):
        key, kw, kb = jax.random.split(key, 3)
        bound = 1.0 / (fan_in ** 0.5)
        params[f"w{i}"] = jax.random.uniform(
            kw, (fan_in, fan_out), jnp.float32, minval=-bound, maxval=bound)
        params[f"b{i}"] = jax.random.uniform(
            kb, (fan_out,), jnp.float32, minval=-bound, maxval=bound)
    return params


def reference_forward(x, params):
    """Pure-JAX f32 reference matching the PyTorch forward()."""
    h = x
    for i in range(1, 4):
        h = h @ params[f"w{i}"] + params[f"b{i}"]
        h = jnp.where(h > 0, h, NEG_SLOPE * h)
    logits = h @ params["w4"] + params["b4"]
    return jax.nn.softmax(logits, axis=1)


if __name__ == "__main__":
    key = jax.random.PRNGKey(0)
    k_params, k_x = jax.random.split(key)

    batch = 8
    input_size = 16
    num_actions = 4

    params = init_params(k_params, input_size, num_actions)
    x = jax.random.normal(k_x, (batch, input_size), jnp.float32)

    prepped = prepare_params(params, input_size, num_actions)
    out = policy_network_forward(x, prepped, num_actions)
    out = jax.block_until_ready(out)

    ref = reference_forward(x, params)

    assert out.shape == (batch, num_actions)
    # Softmax rows must sum to 1 (approx reciprocal + Newton step keeps ~1e-6).
    assert jnp.allclose(jnp.sum(out, axis=1), 1.0, atol=1e-4)
    # bf16 matmul inputs with f32 accumulation vs. full-f32 reference.
    assert jnp.allclose(out, ref, atol=2e-2, rtol=2e-2)

    print("KERNEL_OK")
</pallas_src>

<mosaic_0001>
module attributes {stable_mosaic.version = 11 : i64} {
  func.func @policy_net_kernel(%arg0: i32, %arg1: memref<16x16xf32, #tpu.memory_space<vmem>>, %arg2: memref<16x128xbf16, #tpu.memory_space<vmem>>, %arg3: memref<3x128x128xbf16, #tpu.memory_space<vmem>>, %arg4: memref<4x128xf32, #tpu.memory_space<vmem>>, %arg5: memref<16x8xf32, #tpu.memory_space<vmem>>) attributes {dimension_semantics = [#tpu.dimension_semantics<parallel>], iteration_bounds = array<i64: 1>, scalar_prefetch = 0 : i64, scratch_operands = 0 : i64, tpu.core_type = #tpu.core_type<tc>, window_params = [{transform_indices = @transform_0, window_bounds = array<i64: 16, 16>}, {pipeline_mode = #tpu.pipeline_mode<synchronous>, transform_indices = @transform_1, window_bounds = array<i64: 16, 128>}, {pipeline_mode = #tpu.pipeline_mode<synchronous>, transform_indices = @transform_2, window_bounds = array<i64: 3, 128, 128>}, {pipeline_mode = #tpu.pipeline_mode<synchronous>, transform_indices = @transform_3, window_bounds = array<i64: 4, 128>}, {transform_indices = @transform_4, window_bounds = array<i64: 16, 8>}]} {
    %c0 = arith.constant 0 : index
    %c0_0 = arith.constant 0 : index
    %0 = vector.load %arg1[%c0, %c0_0] : memref<16x16xf32, #tpu.memory_space<vmem>>, vector<16x16xf32>
    %1 = arith.truncf %0 : vector<16x16xf32> to vector<16x16xbf16>
    %c0_1 = arith.constant 0 : index
    %c0_2 = arith.constant 0 : index
    %2 = vector.load %arg4[%c0_1, %c0_2] : memref<4x128xf32, #tpu.memory_space<vmem>>, vector<4x128xf32>
    %c0_3 = arith.constant 0 : index
    %c0_4 = arith.constant 0 : index
    %3 = vector.load %arg2[%c0_3, %c0_4] : memref<16x128xbf16, #tpu.memory_space<vmem>>, vector<16x128xbf16>
    %cst = arith.constant dense<0.000000e+00> : vector<16x128xf32>
    %4 = tpu.matmul %1, %3, %cst {dimension_numbers = #tpu.dot_dimension_numbers<[1], [0], [0], [1], [0, 0, 1, 1], [], []>} : vector<16x16xbf16>, vector<16x128xbf16>, vector<16x128xf32> -> vector<16x128xf32>
    %5 = vector.extract_strided_slice %2 {offsets = [0, 0], sizes = [1, 128], strides = [1, 1]} : vector<4x128xf32> to vector<1x128xf32>
    %6 = vector.broadcast %5 : vector<1x128xf32> to vector<16x128xf32>
    %7 = arith.addf %4, %6 : vector<16x128xf32>
    %cst_5 = arith.constant 0.000000e+00 : f32
    %8 = vector.broadcast %cst_5 : f32 to vector<16x128xf32>
    %9 = arith.cmpf ogt, %7, %8 : vector<16x128xf32>
    %cst_6 = arith.constant 0.00999999977 : f32
    %10 = vector.broadcast %cst_6 : f32 to vector<16x128xf32>
    %11 = arith.mulf %10, %7 : vector<16x128xf32>
    %12 = arith.select %9, %7, %11 : vector<16x128xi1>, vector<16x128xf32>
    %13 = arith.truncf %12 : vector<16x128xf32> to vector<16x128xbf16>
    %c0_7 = arith.constant 0 : index
    %c0_8 = arith.constant 0 : index
    %c0_9 = arith.constant 0 : index
    %14 = vector.load %arg3[%c0_7, %c0_8, %c0_9] : memref<3x128x128xbf16, #tpu.memory_space<vmem>>, vector<1x128x128xbf16>
    %15 = vector.shape_cast %14 : vector<1x128x128xbf16> to vector<128x128xbf16>
    %cst_10 = arith.constant dense<0.000000e+00> : vector<16x128xf32>
    %16 = tpu.matmul %13, %15, %cst_10 {dimension_numbers = #tpu.dot_dimension_numbers<[1], [0], [0], [1], [0, 0, 1, 1], [], []>} : vector<16x128xbf16>, vector<128x128xbf16>, vector<16x128xf32> -> vector<16x128xf32>
    %17 = vector.extract_strided_slice %2 {offsets = [1, 0], sizes = [1, 128], strides = [1, 1]} : vector<4x128xf32> to vector<1x128xf32>
    %18 = vector.broadcast %17 : vector<1x128xf32> to vector<16x128xf32>
    %19 = arith.addf %16, %18 : vector<16x128xf32>
    %cst_11 = arith.constant 0.000000e+00 : f32
    %20 = vector.broadcast %cst_11 : f32 to vector<16x128xf32>
    %21 = arith.cmpf ogt, %19, %20 : vector<16x128xf32>
    %cst_12 = arith.constant 0.00999999977 : f32
    %22 = vector.broadcast %cst_12 : f32 to vector<16x128xf32>
    %23 = arith.mulf %22, %19 : vector<16x128xf32>
    %24 = arith.select %21, %19, %23 : vector<16x128xi1>, vector<16x128xf32>
    %25 = arith.truncf %24 : vector<16x128xf32> to vector<16x128xbf16>
    %c1 = arith.constant 1 : index
    %c0_13 = arith.constant 0 : index
    %c0_14 = arith.constant 0 : index
    %26 = vector.load %arg3[%c1, %c0_13, %c0_14] : memref<3x128x128xbf16, #tpu.memory_space<vmem>>, vector<1x128x128xbf16>
    %27 = vector.shape_cast %26 : vector<1x128x128xbf16> to vector<128x128xbf16>
    %cst_15 = arith.constant dense<0.000000e+00> : vector<16x128xf32>
    %28 = tpu.matmul %25, %27, %cst_15 {dimension_numbers = #tpu.dot_dimension_numbers<[1], [0], [0], [1], [0, 0, 1, 1], [], []>} : vector<16x128xbf16>, vector<128x128xbf16>, vector<16x128xf32> -> vector<16x128xf32>
    %29 = vector.extract_strided_slice %2 {offsets = [2, 0], sizes = [1, 128], strides = [1, 1]} : vector<4x128xf32> to vector<1x128xf32>
    %30 = vector.broadcast %29 : vector<1x128xf32> to vector<16x128xf32>
    %31 = arith.addf %28, %30 : vector<16x128xf32>
    %cst_16 = arith.constant 0.000000e+00 : f32
    %32 = vector.broadcast %cst_16 : f32 to vector<16x128xf32>
    %33 = arith.cmpf ogt, %31, %32 : vector<16x128xf32>
    %cst_17 = arith.constant 0.00999999977 : f32
    %34 = vector.broadcast %cst_17 : f32 to vector<16x128xf32>
    %35 = arith.mulf %34, %31 : vector<16x128xf32>
    %36 = arith.select %33, %31, %35 : vector<16x128xi1>, vector<16x128xf32>
    %37 = arith.truncf %36 : vector<16x128xf32> to vector<16x128xbf16>
    %c2 = arith.constant 2 : index
    %c0_18 = arith.constant 0 : index
    %c0_19 = arith.constant 0 : index
    %38 = vector.load %arg3[%c2, %c0_18, %c0_19] : memref<3x128x128xbf16, #tpu.memory_space<vmem>>, vector<1x128x128xbf16>
    %39 = vector.shape_cast %38 : vector<1x128x128xbf16> to vector<128x128xbf16>
    %cst_20 = arith.constant dense<0.000000e+00> : vector<16x128xf32>
    %40 = tpu.matmul %37, %39, %cst_20 {dimension_numbers = #tpu.dot_dimension_numbers<[1], [0], [0], [1], [0, 0, 1, 1], [], []>} : vector<16x128xbf16>, vector<128x128xbf16>, vector<16x128xf32> -> vector<16x128xf32>
    %41 = vector.extract_strided_slice %2 {offsets = [3, 0], sizes = [1, 128], strides = [1, 1]} : vector<4x128xf32> to vector<1x128xf32>
    %42 = vector.broadcast %41 : vector<1x128xf32> to vector<16x128xf32>
    %43 = arith.addf %40, %42 : vector<16x128xf32>
    %cst_21 = arith.constant dense<0xFF800000> : vector<16xf32>
    %44 = vector.multi_reduction <maximumf>, %43, %cst_21 [1] : vector<16x128xf32> to vector<16xf32>
    %45 = vector.shape_cast %44 : vector<16xf32> to vector<16x1xf32>
    %46 = vector.broadcast %45 : vector<16x1xf32> to vector<16x128xf32>
    %47 = arith.subf %43, %46 : vector<16x128xf32>
    %48 = math.exp %47 : vector<16x128xf32>
    %cst_22 = arith.constant dense<0.000000e+00> : vector<16xf32>
    %49 = vector.multi_reduction <add>, %48, %cst_22 [1] : vector<16x128xf32> to vector<16xf32>
    %50 = vector.shape_cast %49 : vector<16xf32> to vector<16x1xf32>
    %51 = tpu.reciprocal %50 {approx = true} : vector<16x1xf32> -> vector<16x1xf32>
    %52 = arith.mulf %50, %51 : vector<16x1xf32>
    %cst_23 = arith.constant 2.000000e+00 : f32
    %53 = vector.broadcast %cst_23 : f32 to vector<16x1xf32>
    %54 = arith.subf %53, %52 : vector<16x1xf32>
    %55 = arith.mulf %51, %54 : vector<16x1xf32>
    %56 = vector.broadcast %55 : vector<16x1xf32> to vector<16x128xf32>
    %57 = arith.mulf %48, %56 : vector<16x128xf32>
    %58 = vector.extract_strided_slice %57 {offsets = [0, 0], sizes = [16, 8], strides = [1, 1]} : vector<16x128xf32> to vector<16x8xf32>
    %c0_24 = arith.constant 0 : index
    %c0_25 = arith.constant 0 : index
    %59 = vector.load %arg5[%c0_24, %c0_25] : memref<16x8xf32, #tpu.memory_space<vmem>>, vector<16x8xf32>
    tpu.vector_store %arg5[%c0_24, %c0_25], %58 {strides = array<i32>} : memref<16x8xf32, #tpu.memory_space<vmem>>, vector<16x8xf32>,
    return
  }
  func.func @transform_0(%arg0: i32) -> (i32, i32) {
    %c0_i32 = arith.constant 0 : i32
    %c0_i32_0 = arith.constant 0 : i32
    return %arg0, %c0_i32 : i32, i32
  }
  func.func @transform_1(%arg0: i32) -> (i32, i32) {
    %c0_i32 = arith.constant 0 : i32
    %c0_i32_0 = arith.constant 0 : i32
    %c0_i32_1 = arith.constant 0 : i32
    return %c0_i32, %c0_i32_0 : i32, i32
  }
  func.func @transform_2(%arg0: i32) -> (i32, i32, i32) {
    %c0_i32 = arith.constant 0 : i32
    %c0_i32_0 = arith.constant 0 : i32
    %c0_i32_1 = arith.constant 0 : i32
    %c0_i32_2 = arith.constant 0 : i32
    return %c0_i32, %c0_i32_0, %c0_i32_1 : i32, i32, i32
  }
  func.func @transform_3(%arg0: i32) -> (i32, i32) {
    %c0_i32 = arith.constant 0 : i32
    %c0_i32_0 = arith.constant 0 : i32
    %c0_i32_1 = arith.constant 0 : i32
    return %c0_i32, %c0_i32_0 : i32, i32
  }
  func.func @transform_4(%arg0: i32) -> (i32, i32) {
    %c0_i32 = arith.constant 0 : i32
    %c0_i32_0 = arith.constant 0 : i32
    return %arg0, %c0_i32 : i32, i32
  }
}

</mosaic_0001>

<bundles_post_ra>
// kernel: tpu_custom_call.1
= control target key start
LH: loop header
LB: loop body
LE: loop exit
PB: predicated region body
PF: predicated region fallthrough
CT: control target
= control target key end

     0   :  { %9 = vsyncpa [#allocation3], 0  ;;  %s866_s0 = inlined_call_operand.hbm [shape: f32[16,16], index: 0, kind: input, shape index: {}]   ;;  %s867_s1 = inlined_call_operand.hbm [shape: bf16[16,128], index: 1, kind: input, shape index: {}]   ;;  %s868_s2 = inlined_call_operand.hbm [shape: bf16[3,128,128], index: 2, kind: input, shape index: {}]   ;;  %s869_s3 = inlined_call_operand.vmem [shape: f32[4,128], index: 3, kind: input, shape index: {}]   ;;  %s870_s4 = inlined_call_operand.vmem [shape: f32[16,8], index: 4, kind: output, shape index: {}]  }
   0x1   :  { %10 = vsyncpa [#allocation5], 0  ;;  %s736_s15 = smov [#allocation4]   ;;  %s666_s19 = scalar_lea.hbm %s867_s1, 128 }
   0x2   :  { %s28_s16 = sshll.u32 %s736_s15, 4  ;;  %p667_p0 = scmp.ne.s32.totalorder %s867_s1, %s666_s19  ;;  %s29_s16 = int_to_ptr.vmem [resolvable:$true] %s28_s16 }
   0x3   :  { %p670_p1 = scmp.lt.u32.totalorder %s666_s19, %s867_s1 }
   0x5   :  { %p672_p2 = pnand %p670_p1, %p667_p0 }
   0x7   :  { %675 = shalt.err (!%p672_p2)
}
   0x8   :  { %s676_s24 = scalar_lea.vmem %s29_s16, 128  ;;  %p681_p4 = scmp.lt.s32.totalorder %s29_s16, %s29_s16 }
   0x9   :  { %p677_p3 = scmp.ne.s32.totalorder %s29_s16, %s676_s24  ;;  %p682_p5 = scmp.lt.s32.totalorder %s676_s24, %s676_s24 }
   0xb   :  { %p683_p6 = por %p682_p5, %p681_p4 }
   0xd   :  { %p684_p7 = pnand %p683_p6, %p677_p3 }
   0xf   :  { %687 = shalt.err (!%p684_p7)
}
  0x10   :  { %s737_s25 = smov 64   ;;  %s738_s26 = smov 4  }
  0x11   :  { %34 = dma.hbm_to_vmem [thread:$0]  %s867_s1, 128, %s29_s16, [#allocation5], %s737_s25, %s737_s25, %s738_s26  }
  0x12   :  { %s739_s29 = smov [#allocation2]   ;;  %s688_s7 = scalar_lea.hbm %s866_s0, 256 }
  0x13   :  { %s16_s30 = sshll.u32 %s739_s29, 4  ;;  %p689_p8 = scmp.ne.s32.totalorder %s866_s0, %s688_s7  ;;  %s17_s30 = int_to_ptr.vmem [resolvable:$true] %s16_s30 }
  0x14   :  { %p692_p9 = scmp.lt.u32.totalorder %s688_s7, %s866_s0 }
  0x16   :  { %p694_p10 = pnand %p692_p9, %p689_p8 }
  0x18   :  { %697 = shalt.err (!%p694_p10)
}
  0x19   :  { %s698_s12 = scalar_lea.vmem %s17_s30, 256  ;;  %p703_p12 = scmp.lt.s32.totalorder %s17_s30, %s17_s30 }
  0x1a   :  { %p699_p11 = scmp.ne.s32.totalorder %s17_s30, %s698_s12  ;;  %p704_p13 = scmp.lt.s32.totalorder %s698_s12, %s698_s12 }
  0x1c   :  { %p705_p0 = por %p704_p13, %p703_p12 }
  0x1e   :  { %p706_p1 = pnand %p705_p0, %p699_p11 }
  0x20   :  { %709 = shalt.err (!%p706_p1)
}
  0x21   :  { %s740_s1 = smov 128   ;;  %s741_s13 = smov 8  }
  0x22   :  { %22 = dma.hbm_to_vmem [thread:$0]  %s866_s0, 256, %s17_s30, [#allocation3], %s740_s1, %s740_s1, %s741_s13  }
  0x23   :  { %s742_s16 = smov [#allocation6]   ;;  %s710_s20 = scalar_lea.hbm %s868_s2, 3072 }
  0x24   :  { %s40_s17 = sshll.u32 %s742_s16, 4  ;;  %p711_p2 = scmp.ne.s32.totalorder %s868_s2, %s710_s20  ;;  %s41_s17 = int_to_ptr.vmem [resolvable:$true] %s40_s17 }
  0x25   :  { %p714_p3 = scmp.lt.u32.totalorder %s710_s20, %s868_s2 }
  0x27   :  { %p716_p4 = pnand %p714_p3, %p711_p2 }
  0x29   :  { %719 = shalt.err (!%p716_p4)
}
  0x2a   :  { %s720_s27 = scalar_lea.vmem %s41_s17, 3072  ;;  %p725_p6 = scmp.lt.s32.totalorder %s41_s17, %s41_s17 }
  0x2b   :  { %p721_p5 = scmp.ne.s32.totalorder %s41_s17, %s720_s27  ;;  %p726_p7 = scmp.lt.s32.totalorder %s720_s27, %s720_s27 }
  0x2d   :  { %p727_p8 = por %p726_p7, %p725_p6 }
  0x2f   :  { %p728_p9 = pnand %p727_p8, %p721_p5 }
  0x31   :  { %731 = shalt.err (!%p728_p9)
}
  0x32   :  { %46 = dma.hbm_to_vmem [thread:$0]  %s868_s2, 3072, %s41_s17, [#allocation5], %s737_s25, %s737_s25, %s738_s26  }
  0x33   :  { %732 = dma.done.wait [#allocation3], 256  }
  0x34   :  { %733 = vsyncadd [#allocation3], 4294967040 }
  0x35   :  { %734 = dma.done.wait [#allocation5], 3200  }
  0x36   :  { %735 = vsyncadd [#allocation5], 4294964096  ;;  %v743_v0 = vmov 0.0   ;;  %vm744_vm0 = vmmov 0   ;;  %v633_v1 = vld [vmem:[#allocation4] sm:$0xff]   ;;  %v59_v2 = vld [vmem:[#allocation2] sm:$0xff]  ;;  %v65_v19 = vlaneseq }
  0x37   :  { %558 = vmatprep.subr.bf16.mxu0 %v743_v0  ;;  %560 = vmatprep.mubr.msk.bf16.mxu0 %vm744_vm0, %v743_v0  ;;  %v60_v3 = vld [vmem:[#allocation2 + $0x8] sm:$0xff]  ;;  %vm75_vm1 = vcmask 130048   ;;  %v634_v5 = vld [vmem:[#allocation6] sm:$0xff]   ;;  %v635_v6 = vld [vmem:[#allocation6 + $0x8] sm:$0xff]   ;;  %vm494_vm8 = vcmask 64512  }
  0x38   :  { %564 = vmatprep.subr.bf16.mxu1 %v743_v0  ;;  %580 = vmatprep.mubr.msk.bf16.mxu1 %vm744_vm0, %v743_v0  ;;  %v61_v4 = vpack.c.bf16 %v60_v3, %v59_v2  ;;  %v636_v7 = vld [vmem:[#allocation6 + $0x10] sm:$0xff]   ;;  %v637_v8 = vld [vmem:[#allocation6 + $0x18] sm:$0xff]   ;;  %v638_v9 = vld [vmem:[#allocation6 + $0x20] sm:$0xff]   ;;  %v835_v20 = vshrl.u32 %v65_v19, 7 }
  0x39   :  { %559 = vmatpush3.bf16.msra.mxu0 %v633_v1  ;;  %565 = vmatpush3.bf16.msra.mxu1 %v634_v5  ;;  %v639_v10 = vld [vmem:[#allocation6 + $0x28] sm:$0xff]   ;;  %v640_v11 = vld [vmem:[#allocation6 + $0x30] sm:$0xff]   ;;  %v641_v12 = vld [vmem:[#allocation6 + $0x38] sm:$0xff]  }
  0x3a   :  { %584 = vmatprep.subr.bf16.mxu0 %v743_v0  ;;  %566 = vmatprep.subr.bf16.mxu1 %v743_v0  ;;  %v642_v13 = vld [vmem:[#allocation6 + $0x40] sm:$0xff]   ;;  %v643_v14 = vld [vmem:[#allocation6 + $0x48] sm:$0xff]   ;;  %v644_v15 = vld [vmem:[#allocation6 + $0x50] sm:$0xff]   ;;  %v67_v21 = vsub.s32 0, %v835_v20  ;;  %v145_v43 = vsub.s32 1, %v835_v20  ;;  %v262_v58 = vsub.s32 2, %v835_v20 }
  0x3b   :  { %v645_v16 = vld [vmem:[#allocation6 + $0x58] sm:$0xff]   ;;  %v646_v17 = vld [vmem:[#allocation6 + $0x60] sm:$0xff]   ;;  %v647_v18 = vld [vmem:[#allocation6 + $0x68] sm:$0xff]  }
  0x3c   :  { %561 = vmatmul.mubr.msk.bf16.vlgmr.msra.gmra.mrb[0].mxu0 %vm75_vm1, %v61_v4  ;;  %v841_v22 = vld [vmem:[%s869_s3] sm:$0xf]  ;;  %v648_v35 = vld [vmem:[#allocation6 + $0x70] sm:$0xff]   ;;  %v650_v37 = vld [vmem:[#allocation6 + $0x80] sm:$0xff]  }
  0x3d   :  { %600 = vmatprep.mubr.msk.bf16.mxu0 %vm744_vm0, %v743_v0  ;;  %567 = vmatpush3.bf16.msra.mxu1 %v635_v6  ;;  %v68_v23 = vrot.slane %v841_v22, %v67_v21  ;;  %v649_v36 = vld [vmem:[#allocation6 + $0x78] sm:$0xff]   ;;  %v651_v38 = vld [vmem:[#allocation6 + $0x88] sm:$0xff]   ;;  %v652_v39 = vld [vmem:[#allocation6 + $0x90] sm:$0xff]   ;;  %v146_v44 = vrot.slane %v841_v22, %v145_v43  ;;  %v263_v59 = vrot.slane %v841_v22, %v262_v58 }
  0x3e   :  { %568 = vmatprep.subr.bf16.mxu1 %v743_v0  ;;  %585 = vmatpush3.bf16.msra.mxu0 %v642_v13  ;;  %v653_v40 = vld [vmem:[#allocation6 + $0x98] sm:$0xff]   ;;  %v654_v41 = vld [vmem:[#allocation6 + $0xa0] sm:$0xff]   ;;  %v655_v42 = vld [vmem:[#allocation6 + $0xa8] sm:$0xff]  }
  0x3f   :  { %586 = vmatprep.subr.bf16.mxu0 %v743_v0  ;;  %v656_v56 = vld [vmem:[#allocation6 + $0xb0] sm:$0xff]   ;;  %v657_v57 = vld [vmem:[#allocation6 + $0xb8] sm:$0xff]  }
  0x41   :  { %569 = vmatpush3.bf16.msra.mxu1 %v636_v7 }
  0x42   :  { %570 = vmatprep.subr.bf16.mxu1 %v743_v0  ;;  %587 = vmatpush3.bf16.msra.mxu0 %v643_v14 }
  0x43   :  { %588 = vmatprep.subr.bf16.mxu0 %v743_v0 }
  0x45   :  { %571 = vmatpush3.bf16.msra.mxu1 %v637_v8 }
  0x46   :  { %572 = vmatprep.subr.bf16.mxu1 %v743_v0  ;;  %589 = vmatpush3.bf16.msra.mxu0 %v644_v15 }
  0x47   :  { %590 = vmatprep.subr.bf16.mxu0 %v743_v0 }
  0x49   :  { %573 = vmatpush3.bf16.msra.mxu1 %v638_v9 }
  0x4a   :  { %574 = vmatprep.subr.bf16.mxu1 %v743_v0  ;;  %591 = vmatpush3.bf16.msra.mxu0 %v645_v16 }
  0x4b   :  { %592 = vmatprep.subr.bf16.mxu0 %v743_v0 }
  0x4d   :  { %575 = vmatpush3.bf16.msra.mxu1 %v639_v10 }
  0x4e   :  { %576 = vmatprep.subr.bf16.mxu1 %v743_v0  ;;  %593 = vmatpush3.bf16.msra.mxu0 %v646_v17 }
  0x4f   :  { %594 = vmatprep.subr.bf16.mxu0 %v743_v0 }
  0x51   :  { %577 = vmatpush3.bf16.msra.mxu1 %v640_v11 }
  0x52   :  { %578 = vmatprep.subr.bf16.mxu1 %v743_v0  ;;  %595 = vmatpush3.bf16.msra.mxu0 %v647_v18 }
  0x53   :  { %596 = vmatprep.subr.bf16.mxu0 %v743_v0 }
  0x55   :  { %579 = vmatpush3.bf16.msra.mxu1 %v641_v12 }
  0x56   :  { %604 = vmatprep.subr.bf16.mxu1 %v743_v0  ;;  %597 = vmatpush3.bf16.msra.mxu0 %v648_v35 }
  0x57   :  { %598 = vmatprep.subr.bf16.mxu0 %v743_v0 }
  0x5a   :  { %599 = vmatpush3.bf16.msra.mxu0 %v649_v36 }
 0x10f   :  { %v113_v24 = vpop.f32.mrb[0].mxu0 }
 0x110   :  { %v114_v25 = vadd.f32 %v113_v24, %v68_v23  ;;  %v562_v26 = vpop.f32.mrb[1].mxu0 }
 0x111   :  { %v116_v27 = vpop.f32.mrb[2].mxu0 }
 0x112   :  { %v122_v28 = vmul.f32 0.01, %v114_v25  ;;  %v117_v29 = vadd.f32 %v116_v27, %v68_v23  ;;  %v563_v30 = vpop.f32.mrb[3].mxu0  ;;  %vm120_vm2 = vcmp.gt.f32.partialorder %v114_v25, 0.0 }
 0x114   :  { %vm121_vm3 = vcmp.gt.f32.partialorder %v117_v29, 0.0  ;;  %v123_v31 = vmul.f32 0.01, %v117_v29  ;;  %v124_v32 = vsel %vm120_vm2, %v114_v25, %v122_v28 }
 0x116   :  { %v125_v33 = vsel %vm121_vm3, %v117_v29, %v123_v31 }
 0x117   :  { %v126_v34 = vpack.c.bf16 %v125_v33, %v124_v32 }
 0x119   :  { %581 = vmatmul.mubr.bf16.vlgmr.msra.gmra.mrb[0].mxu1 %v126_v34 }
 0x11a   :  { %620 = vmatprep.mubr.msk.bf16.mxu1 %vm744_vm0, %v743_v0  ;;  %605 = vmatpush3.bf16.msra.mxu1 %v650_v37 }
 0x11b   :  { %606 = vmatprep.subr.bf16.mxu1 %v743_v0 }
 0x11e   :  { %607 = vmatpush3.bf16.msra.mxu1 %v651_v38 }
 0x11f   :  { %608 = vmatprep.subr.bf16.mxu1 %v743_v0 }
 0x122   :  { %609 = vmatpush3.bf16.msra.mxu1 %v652_v39 }
 0x123   :  { %610 = vmatprep.subr.bf16.mxu1 %v743_v0 }
 0x126   :  { %611 = vmatpush3.bf16.msra.mxu1 %v653_v40 }
 0x127   :  { %612 = vmatprep.subr.bf16.mxu1 %v743_v0 }
 0x12a   :  { %613 = vmatpush3.bf16.msra.mxu1 %v654_v41 }
 0x12b   :  { %614 = vmatprep.subr.bf16.mxu1 %v743_v0 }
 0x12e   :  { %615 = vmatpush3.bf16.msra.mxu1 %v655_v42 }
 0x12f   :  { %616 = vmatprep.subr.bf16.mxu1 %v743_v0 }
 0x132   :  { %617 = vmatpush3.bf16.msra.mxu1 %v656_v56 }
 0x133   :  { %618 = vmatprep.subr.bf16.mxu1 %v743_v0  ;;  %v379_v0 = vsub.s32 3, %v835_v20 }
 0x135   :  { %v380_v8 = vrot.slane %v841_v22, %v379_v0 }
 0x136   :  { %619 = vmatpush3.bf16.msra.mxu1 %v657_v57 }
 0x1ec   :  { %v229_v45 = vpop.f32.mrb[0].mxu1 }
 0x1ed   :  { %v230_v46 = vadd.f32 %v229_v45, %v146_v44  ;;  %v582_v47 = vpop.f32.mrb[1].mxu1 }
 0x1ee   :  { %v232_v48 = vpop.f32.mrb[2].mxu1 }
 0x1ef   :  { %v238_v49 = vmul.f32 0.01, %v230_v46  ;;  %v233_v50 = vadd.f32 %v232_v48, %v146_v44  ;;  %v583_v51 = vpop.f32.mrb[3].mxu1  ;;  %vm236_vm4 = vcmp.gt.f32.partialorder %v230_v46, 0.0 }
 0x1f1   :  { %vm237_vm5 = vcmp.gt.f32.partialorder %v233_v50, 0.0  ;;  %v239_v52 = vmul.f32 0.01, %v233_v50  ;;  %v240_v53 = vsel %vm236_vm4, %v230_v46, %v238_v49 }
 0x1f3   :  { %v241_v54 = vsel %vm237_vm5, %v233_v50, %v239_v52 }
 0x1f4   :  { %v242_v55 = vpack.c.bf16 %v241_v54, %v240_v53 }
 0x1f6   :  { %601 = vmatmul.mubr.bf16.vlgmr.msra.gmra.mrb[4].mxu0 %v242_v55 }
 0x2c9   :  { %v346_v60 = vpop.f32.mrb[4].mxu0 }
 0x2ca   :  { %v347_v61 = vadd.f32 %v346_v60, %v263_v59  ;;  %v602_v62 = vpop.f32.mrb[5].mxu0 }
 0x2cb   :  { %v349_v63 = vpop.f32.mrb[6].mxu0 }
 0x2cc   :  { %v355_v1 = vmul.f32 0.01, %v347_v61  ;;  %v350_v2 = vadd.f32 %v349_v63, %v263_v59  ;;  %v603_v3 = vpop.f32.mrb[7].mxu0  ;;  %vm353_vm6 = vcmp.gt.f32.partialorder %v347_v61, 0.0 }
 0x2ce   :  { %vm354_vm7 = vcmp.gt.f32.partialorder %v350_v2, 0.0  ;;  %v356_v4 = vmul.f32 0.01, %v350_v2  ;;  %v357_v5 = vsel %vm353_vm6, %v347_v61, %v355_v1 }
 0x2d0   :  { %v358_v6 = vsel %vm354_vm7, %v350_v2, %v356_v4 }
 0x2d1   :  { %v359_v7 = vpack.c.bf16 %v358_v6, %v357_v5 }
 0x2d3   :  { %621 = vmatmul.mubr.bf16.vlgmr.msra.gmra.mrb[4].mxu1 %v359_v7 }
 0x3a6   :  { %v463_v9 = vpop.f32.mrb[4].mxu1 }
 0x3a7   :  { %v464_v10 = vadd.f32 %v463_v9, %v380_v8  ;;  %v622_v11 = vpop.f32.mrb[5].mxu1 }
 0x3a8   :  { %v466_v12 = vpop.f32.mrb[6].mxu1 }
 0x3a9   :  { %470 = vmax.xlane.f32.xlu0 %v464_v10  ;;  %v623_v13 = vpop.f32.mrb[7].mxu1  ;;  %v467_v14 = vadd.f32 %v466_v12, %v380_v8 }
 0x3ad   :  { %472 = vmax.xlane.f32.xlu0 %v467_v14 }
 0x436   :  { %v471_v15 = vpop.xlane.xlu0 %470 }
 0x437   :  { %v474_v16 = vsub.f32 %v464_v10, %v471_v15 }
 0x439   :  { %v476_v17 = vmul.f32 1.442695, %v474_v16 }
 0x43a   :  { %v473_v18 = vpop.xlane.xlu0 %472 }
 0x43b   :  { %658 = vpow2.f32 %v476_v17  ;;  %v475_v19 = vsub.f32 %v467_v14, %v473_v18 }
 0x43d   :  { %v478_v21 = vmul.f32 1.442695, %v475_v19 }
 0x43f   :  { %660 = vpow2.f32 %v478_v21 }
 0x445   :  { %v659_v23 = vpop.eup %658 }
 0x446   :  { %480 = vadd.xlane.f32.xlu1 %v659_v23 }
 0x449   :  { %v661_v20 = vpop.eup %660 }
 0x44a   :  { %482 = vadd.xlane.f32.xlu1 %v661_v20 }
 0x4d3   :  { %v481_v22 = vpop.xlane.xlu1 %480 }
 0x4d4   :  { %662 = vrcp.f32 %v481_v22 }
 0x4d7   :  { %v483_v24 = vpop.xlane.xlu1 %482 }
 0x4d8   :  { %664 = vrcp.f32 %v483_v24 }
 0x4de   :  { %v663_v25 = vpop.eup %662 }
 0x4df   :  { %v486_v26 = vmul.f32 %v663_v25, %v481_v22 }
 0x4e1   :  { %v488_v27 = vsub.f32 2.0, %v486_v26 }
 0x4e2   :  { %v665_v28 = vpop.eup %664 }
 0x4e3   :  { %v490_v29 = vmul.f32 %v663_v25, %v488_v27  ;;  %v487_v30 = vmul.f32 %v665_v28, %v483_v24 }
 0x4e5   :  { %v492_v31 = vmul.f32 %v659_v23, %v490_v29  ;;  %v489_v32 = vsub.f32 2.0, %v487_v30 }
 0x4e7   :  { %495 = vst.msk [vmem:[%s870_s4] sm:$0xff] %vm494_vm8, %v492_v31  ;;  %v491_v33 = vmul.f32 %v665_v28, %v489_v32 }
 0x4e9   :  { %v493_v34 = vmul.f32 %v661_v20, %v491_v33 }
 0x4eb   :  { %496 = vst.msk [vmem:[%s870_s4 + $0x8] sm:$0xff] %vm494_vm8, %v493_v34 }
 0x4ec   :  { %501 = vsyncpa [#allocation3], 1 }
 0x4ed   :  { %502 = vsyncpa [#allocation5], 1 }

</bundles_post_ra>
